<compile_context>
chip_gen: v7x
topology: tpu7x:2x2x1
jax: 0.10.0
libtpu: 0.0.40
codegen_flags: <defaults>
</compile_context>

<pallas_src>
import functools

import jax
import jax.numpy as jnp
from jax import lax
from jax.experimental import pallas as pl
from jax.experimental.pallas import tpu as pltpu


# ----------------------------------------------------------------------------
# Chip-aware budgets
# ----------------------------------------------------------------------------

def _vmem_budgets():
    """(target block bytes, scoped vmem limit) chosen from the VMEM capacity."""
    cap = 64 * 1024 * 1024  # conservative default (v7x-sized)
    try:
        info = pltpu.get_tpu_info()
        c = getattr(info, "vmem_capacity_bytes", None)
        if c:
            cap = int(c)
    except Exception:
        pass
    if cap >= 96 * 1024 * 1024:           # v5e / v6e: 128 MiB VMEM
        return 6 * 1024 * 1024, 80 * 1024 * 1024
    return 2 * 1024 * 1024, 32 * 1024 * 1024   # v7x (64 MiB) / unknown


_TARGET_BLOCK_BYTES, _VMEM_LIMIT_BYTES = _vmem_budgets()


# ----------------------------------------------------------------------------
# Kernels
# ----------------------------------------------------------------------------

def _ln_lane_kernel(x_ref, w_ref, b_ref, o_ref, *, eps, inv_c):
    """LayerNorm over the LAST (lane) axis of a (TR, C) block. w/b: (1, C) f32."""
    x = x_ref[...].astype(jnp.float32)
    s1 = jnp.sum(x, axis=-1, keepdims=True)
    s2 = jnp.sum(x * x, axis=-1, keepdims=True)
    u = s1 * inv_c
    var = jnp.maximum(s2 * inv_c - u * u, 0.0)     # guard one-pass cancellation
    inv = lax.rsqrt(var + eps)                     # EUP
    y = (x - u) * inv
    y = y * w_ref[...] + b_ref[...]
    o_ref[...] = y.astype(o_ref.dtype)


def _ln_sublane_kernel(x_ref, w_ref, b_ref, o_ref, *, eps, inv_c):
    """LayerNorm over the CHANNEL (sublane) axis of a (TB, C, THW) block.

    Used for channels_first (NCHW) inputs viewed as (B, C, H*W): no transpose
    needed, H*W stays dense on the lane axis. w/b: (C, 1) f32 (broadcast over
    lanes and the leading batch-block axis).
    """
    x = x_ref[...].astype(jnp.float32)             # (TB, C, THW)
    s1 = jnp.sum(x, axis=1, keepdims=True)         # (TB, 1, THW)
    s2 = jnp.sum(x * x, axis=1, keepdims=True)
    u = s1 * inv_c
    var = jnp.maximum(s2 * inv_c - u * u, 0.0)
    inv = lax.rsqrt(var + eps)
    y = (x - u) * inv
    y = y * w_ref[...] + b_ref[...]
    o_ref[...] = y.astype(o_ref.dtype)


# ----------------------------------------------------------------------------
# Tiling helper + pallas_call wrappers
# ----------------------------------------------------------------------------

def _pick_tile(n, row_bytes, align, target_bytes=None, cap=8192):
    """Length of the tiled axis: ~target_bytes per block, multiple of `align`,
    prefers an exact divisor of `n`, and keeps the grid length >= 2 when it
    can (so a parallel grid axis shards across v7x's two TensorCores)."""
    if target_bytes is None:
        target_bytes = _TARGET_BLOCK_BYTES
    n = int(n)
    t = max(1, int(target_bytes) // max(1, int(row_bytes)))
    t = min(t, cap)
    t = max(align, (t // align) * align)
    if t >= n:
        half = (n // 2 // align) * align
        t = half if half >= align else n           # block == full dim is legal
    if t != n and n % t != 0:
        d = t
        while d >= align:                          # prefer an aligned divisor
            if n % d == 0:
                t = d
                break
            d -= align
        # else: fall back to pl.cdiv grid with a masked boundary block
    return t


def _layer_norm_lanes(x2d, w_row, b_row, eps):
    """LayerNorm over the last axis of a (N, C) array (channels_last path)."""
    N, C = x2d.shape
    itemsize = x2d.dtype.itemsize
    tr = _pick_tile(N, C * itemsize, align=8)      # dtype-aware block sizing
    grid = (pl.cdiv(N, tr),)
    cost = pl.CostEstimate(flops=int(8 * N * C), transcendentals=int(N),
                           bytes_accessed=int(2 * N * C * itemsize))
    return pl.pallas_call(
        functools.partial(_ln_lane_kernel, eps=eps, inv_c=1.0 / C),
        out_shape=jax.ShapeDtypeStruct((N, C), x2d.dtype),
        grid_spec=pltpu.PrefetchScalarGridSpec(
            num_scalar_prefetch=0,
            grid=grid,
            in_specs=[
                pl.BlockSpec((tr, C), lambda i: (i, 0)),
                pl.BlockSpec((1, C), lambda i: (0, 0)),
                pl.BlockSpec((1, C), lambda i: (0, 0)),
            ],
            out_specs=pl.BlockSpec((tr, C), lambda i: (i, 0)),
        ),
        compiler_params=pltpu.CompilerParams(
            dimension_semantics=("parallel",),
            vmem_limit_bytes=_VMEM_LIMIT_BYTES,
        ),
        cost_estimate=cost,
    )(x2d, w_row, b_row)


def _layer_norm_sublanes(x3d, w_col, b_col, eps):
    """LayerNorm over axis 1 of a (B, C, HW) array (channels_first, no transpose)."""
    B, C, HW = x3d.shape
    itemsize = x3d.dtype.itemsize
    thw = _pick_tile(HW, C * itemsize, align=128)
    tb = 1
    if thw >= HW:
        thw = HW
        # HW fits in one lane-block: batch several images per grid step to hit
        # the byte target instead of issuing tiny blocks.
        per_b = C * HW * itemsize
        tb = max(1, min(B, _TARGET_BLOCK_BYTES // max(1, per_b)))
        while tb > 1 and B % tb != 0:              # prefer a divisor of B
            tb -= 1
        if tb >= B and B >= 2:
            tb = (B + 1) // 2                      # guarantee >= 2 grid steps
    grid = (pl.cdiv(B, tb), pl.cdiv(HW, thw))
    cost = pl.CostEstimate(flops=int(8 * B * C * HW), transcendentals=int(B * HW),
                           bytes_accessed=int(2 * B * C * HW * itemsize))
    return pl.pallas_call(
        functools.partial(_ln_sublane_kernel, eps=eps, inv_c=1.0 / C),
        out_shape=jax.ShapeDtypeStruct((B, C, HW), x3d.dtype),
        grid_spec=pltpu.PrefetchScalarGridSpec(
            num_scalar_prefetch=0,
            grid=grid,
            in_specs=[
                pl.BlockSpec((tb, C, thw), lambda bi, j: (bi, 0, j)),
                pl.BlockSpec((C, 1), lambda bi, j: (0, 0)),
                pl.BlockSpec((C, 1), lambda bi, j: (0, 0)),
            ],
            out_specs=pl.BlockSpec((tb, C, thw), lambda bi, j: (bi, 0, j)),
        ),
        compiler_params=pltpu.CompilerParams(
            dimension_semantics=("parallel", "parallel"),
            vmem_limit_bytes=_VMEM_LIMIT_BYTES,
        ),
        cost_estimate=cost,
    )(x3d, w_col, b_col)


# ----------------------------------------------------------------------------
# Module wrapper (matches the PyTorch LayerNorm semantics of the spec)
# ----------------------------------------------------------------------------

class LayerNorm:
    """Pallas port of ConvNeXt LayerNorm (channels_last / channels_first)."""

    def __init__(self, normalized_shape, eps=1e-6, data_format="channels_last"):
        if data_format not in ("channels_last", "channels_first"):
            raise NotImplementedError
        self.C = int(normalized_shape)
        self.eps = float(eps)
        self.data_format = data_format
        # PyTorch defaults: weight = ones, bias = zeros.
        self.set_params(jnp.ones((self.C,), jnp.float32),
                        jnp.zeros((self.C,), jnp.float32))

    def set_params(self, weight, bias):
        self.weight = jnp.asarray(weight, jnp.float32).reshape(self.C)
        self.bias = jnp.asarray(bias, jnp.float32).reshape(self.C)
        # Cache the f32 (1,C)/(C,1) forms so __call__ does no reshape/convert.
        self._w_row = self.weight.reshape(1, self.C)
        self._b_row = self.bias.reshape(1, self.C)
        self._w_col = self.weight.reshape(self.C, 1)
        self._b_col = self.bias.reshape(self.C, 1)

    def __call__(self, x):
        C = self.C
        if self.data_format == "channels_last":
            lead = x.shape[:-1]
            y = _layer_norm_lanes(x.reshape(-1, C), self._w_row, self._b_row,
                                  self.eps)
            return y.reshape(*lead, C)
        # channels_first NCHW
        B, _, H, W = x.shape
        HW = H * W
        if HW < 256:
            # Deep stages (7x7 / 14x14): lane axis would be <128 wide and every
            # store masked. Tensor is tiny, so transpose outside the kernel and
            # use the lane-dense channels_last path (C there is 128-multiple).
            x_cl = jnp.transpose(x, (0, 2, 3, 1)).reshape(-1, C)
            y = _layer_norm_lanes(x_cl, self._w_row, self._b_row, self.eps)
            return jnp.transpose(y.reshape(B, H, W, C), (0, 3, 1, 2))
        # Large feature maps: transpose-free, normalize over the sublane (C)
        # axis with H*W dense on lanes.
        y = _layer_norm_sublanes(x.reshape(B, C, HW), self._w_col, self._b_col,
                                 self.eps)
        return y.reshape(B, C, H, W)


# ----------------------------------------------------------------------------
# Pure-JAX references + self-test
# ----------------------------------------------------------------------------

def _ref_channels_first(x, w, b, eps):
    x = x.astype(jnp.float32)
    u = jnp.mean(x, axis=1, keepdims=True)
    s = jnp.mean((x - u) ** 2, axis=1, keepdims=True)
    xn = (x - u) / jnp.sqrt(s + eps)
    return w[None, :, None, None] * xn + b[None, :, None, None]


def _ref_channels_last(x, w, b, eps):
    x = x.astype(jnp.float32)
    u = jnp.mean(x, axis=-1, keepdims=True)
    s = jnp.mean((x - u) ** 2, axis=-1, keepdims=True)
    xn = (x - u) / jnp.sqrt(s + eps)
    return xn * w + b


if __name__ == "__main__":
    key = jax.random.PRNGKey(0)
    k1, k2, k3, k4, kw, kb = jax.random.split(key, 6)

    def make_params(C):
        w = 1.0 + 0.1 * jax.random.normal(kw, (C,), jnp.float32)
        b = 0.1 * jax.random.normal(kb, (C,), jnp.float32)
        return w, b

    # 1) channels_first, large feature map -> sublane (transpose-free) path
    C = 128
    x_cf = jax.random.normal(k1, (2, C, 16, 16), jnp.float32)
    ln_cf = LayerNorm(C, eps=1e-6, data_format="channels_first")
    ln_cf.set_params(*make_params(C))
    y_cf = jax.block_until_ready(ln_cf(x_cf))
    ref_cf = _ref_channels_first(x_cf, ln_cf.weight, ln_cf.bias, ln_cf.eps)
    assert y_cf.shape == x_cf.shape
    assert jnp.max(jnp.abs(y_cf - ref_cf)) < 1e-4

    # 2) channels_first, small feature map (7x7) -> lane-routed path
    C2 = 256
    x_cf_s = jax.random.normal(k2, (2, C2, 7, 7), jnp.float32)
    ln_cf_s = LayerNorm(C2, eps=1e-6, data_format="channels_first")
    ln_cf_s.set_params(*make_params(C2))
    y_cf_s = jax.block_until_ready(ln_cf_s(x_cf_s))
    ref_cf_s = _ref_channels_first(x_cf_s, ln_cf_s.weight, ln_cf_s.bias,
                                   ln_cf_s.eps)
    assert y_cf_s.shape == x_cf_s.shape
    assert jnp.max(jnp.abs(y_cf_s - ref_cf_s)) < 1e-4

    # 3) channels_last, f32 (LayerNorm inside ConvNeXt Block)
    x_cl = jax.random.normal(k3, (2, 16, 16, C), jnp.float32)
    ln_cl = LayerNorm(C, eps=1e-6, data_format="channels_last")
    ln_cl.set_params(*make_params(C))
    y_cl = jax.block_until_ready(ln_cl(x_cl))
    ref_cl = _ref_channels_last(x_cl, ln_cl.weight, ln_cl.bias, ln_cl.eps)
    assert y_cl.shape == x_cl.shape
    assert jnp.max(jnp.abs(y_cl - ref_cl)) < 1e-4

    # 4) channels_last, bf16 I/O (dtype-aware block sizing path)
    C3 = 256
    x_bf = jax.random.normal(k4, (2, 8, 8, C3), jnp.float32).astype(jnp.bfloat16)
    ln_bf = LayerNorm(C3, eps=1e-6, data_format="channels_last")
    ln_bf.set_params(*make_params(C3))
    y_bf = jax.block_until_ready(ln_bf(x_bf))
    ref_bf = _ref_channels_last(x_bf, ln_bf.weight, ln_bf.bias, ln_bf.eps)
    assert y_bf.shape == x_bf.shape
    assert y_bf.dtype == jnp.bfloat16
    assert jnp.max(jnp.abs(y_bf.astype(jnp.float32) - ref_bf)) < 5e-2

    print("KERNEL_OK")
</pallas_src>

<mosaic_0001>
module attributes {stable_mosaic.version = 11 : i64} {
  func.func @_ln_sublane_kernel(%arg0: i32, %arg1: i32, %arg2: memref<1x128x128xf32, #tpu.memory_space<vmem>>, %arg3: memref<128x1xf32, #tpu.memory_space<vmem>>, %arg4: memref<128x1xf32, #tpu.memory_space<vmem>>, %arg5: memref<1x128x128xf32, #tpu.memory_space<vmem>>) attributes {dimension_semantics = [#tpu.dimension_semantics<parallel>, #tpu.dimension_semantics<parallel>], iteration_bounds = array<i64: 2, 2>, scalar_prefetch = 0 : i64, scratch_operands = 0 : i64, tpu.core_type = #tpu.core_type<tc>, window_params = [{transform_indices = @transform_0, window_bounds = array<i64: 1, 128, 128>}, {pipeline_mode = #tpu.pipeline_mode<synchronous>, transform_indices = @transform_1, window_bounds = array<i64: 128, 1>}, {pipeline_mode = #tpu.pipeline_mode<synchronous>, transform_indices = @transform_2, window_bounds = array<i64: 128, 1>}, {transform_indices = @transform_3, window_bounds = array<i64: 1, 128, 128>}]} {
    %c0 = arith.constant 0 : index
    %c0_0 = arith.constant 0 : index
    %c0_1 = arith.constant 0 : index
    %0 = vector.load %arg2[%c0, %c0_0, %c0_1] : memref<1x128x128xf32, #tpu.memory_space<vmem>>, vector<1x128x128xf32>
    %cst = arith.constant dense<0.000000e+00> : vector<1x128xf32>
    %1 = vector.multi_reduction <add>, %0, %cst [1] : vector<1x128x128xf32> to vector<1x128xf32>
    %2 = vector.shape_cast %1 : vector<1x128xf32> to vector<1x1x128xf32>
    %3 = arith.mulf %0, %0 : vector<1x128x128xf32>
    %cst_2 = arith.constant dense<0.000000e+00> : vector<1x128xf32>
    %4 = vector.multi_reduction <add>, %3, %cst_2 [1] : vector<1x128x128xf32> to vector<1x128xf32>
    %5 = vector.shape_cast %4 : vector<1x128xf32> to vector<1x1x128xf32>
    %cst_3 = arith.constant 7.812500e-03 : f32
    %6 = vector.broadcast %cst_3 : f32 to vector<1x1x128xf32>
    %7 = arith.mulf %2, %6 : vector<1x1x128xf32>
    %cst_4 = arith.constant 7.812500e-03 : f32
    %8 = vector.broadcast %cst_4 : f32 to vector<1x1x128xf32>
    %9 = arith.mulf %5, %8 : vector<1x1x128xf32>
    %10 = arith.mulf %7, %7 : vector<1x1x128xf32>
    %11 = arith.subf %9, %10 : vector<1x1x128xf32>
    %cst_5 = arith.constant 0.000000e+00 : f32
    %12 = vector.broadcast %cst_5 : f32 to vector<1x1x128xf32>
    %13 = arith.maximumf %11, %12 : vector<1x1x128xf32>
    %cst_6 = arith.constant 9.99999997E-7 : f32
    %14 = vector.broadcast %cst_6 : f32 to vector<1x1x128xf32>
    %15 = arith.addf %13, %14 : vector<1x1x128xf32>
    %16 = math.rsqrt %15 : vector<1x1x128xf32>
    %17 = vector.broadcast %7 : vector<1x1x128xf32> to vector<1x128x128xf32>
    %18 = arith.subf %0, %17 : vector<1x128x128xf32>
    %19 = vector.broadcast %16 : vector<1x1x128xf32> to vector<1x128x128xf32>
    %20 = arith.mulf %18, %19 : vector<1x128x128xf32>
    %c0_7 = arith.constant 0 : index
    %c0_8 = arith.constant 0 : index
    %21 = vector.load %arg3[%c0_7, %c0_8] : memref<128x1xf32, #tpu.memory_space<vmem>>, vector<128x1xf32>
    %22 = vector.shape_cast %21 : vector<128x1xf32> to vector<1x128x1xf32>
    %23 = vector.broadcast %22 : vector<1x128x1xf32> to vector<1x128x128xf32>
    %24 = arith.mulf %20, %23 : vector<1x128x128xf32>
    %c0_9 = arith.constant 0 : index
    %c0_10 = arith.constant 0 : index
    %25 = vector.load %arg4[%c0_9, %c0_10] : memref<128x1xf32, #tpu.memory_space<vmem>>, vector<128x1xf32>
    %26 = vector.shape_cast %25 : vector<128x1xf32> to vector<1x128x1xf32>
    %27 = vector.broadcast %26 : vector<1x128x1xf32> to vector<1x128x128xf32>
    %28 = arith.addf %24, %27 : vector<1x128x128xf32>
    %c0_11 = arith.constant 0 : index
    %c0_12 = arith.constant 0 : index
    %c0_13 = arith.constant 0 : index
    %29 = vector.load %arg5[%c0_11, %c0_12, %c0_13] : memref<1x128x128xf32, #tpu.memory_space<vmem>>, vector<1x128x128xf32>
    tpu.vector_store %arg5[%c0_11, %c0_12, %c0_13], %28 {strides = array<i32>} : memref<1x128x128xf32, #tpu.memory_space<vmem>>, vector<1x128x128xf32>,
    return
  }
  func.func @transform_0(%arg0: i32, %arg1: i32) -> (i32, i32, i32) {
    %c0_i32 = arith.constant 0 : i32
    %c0_i32_0 = arith.constant 0 : i32
    return %arg0, %c0_i32, %arg1 : i32, i32, i32
  }
  func.func @transform_1(%arg0: i32, %arg1: i32) -> (i32, i32) {
    %c0_i32 = arith.constant 0 : i32
    %c0_i32_0 = arith.constant 0 : i32
    %c0_i32_1 = arith.constant 0 : i32
    return %c0_i32, %c0_i32_0 : i32, i32
  }
  func.func @transform_2(%arg0: i32, %arg1: i32) -> (i32, i32) {
    %c0_i32 = arith.constant 0 : i32
    %c0_i32_0 = arith.constant 0 : i32
    %c0_i32_1 = arith.constant 0 : i32
    return %c0_i32, %c0_i32_0 : i32, i32
  }
  func.func @transform_3(%arg0: i32, %arg1: i32) -> (i32, i32, i32) {
    %c0_i32 = arith.constant 0 : i32
    %c0_i32_0 = arith.constant 0 : i32
    return %arg0, %c0_i32, %arg1 : i32, i32, i32
  }
}

</mosaic_0001>

<bundles_post_ra>
// kernel: tpu_custom_call.1
= control target key start
LH: loop header
LB: loop body
LE: loop exit
PB: predicated region body
PF: predicated region fallthrough
CT: control target
= control target key end

     0   :  { %8 = vsyncpa [#allocation3], 0  ;;  %s1415_s0 = inlined_call_operand.hbm [shape: f32[2,128,256], index: 0, kind: input, shape index: {}]   ;;  %s1416_s1 = inlined_call_operand.vmem [shape: f32[128,1], index: 1, kind: input, shape index: {}]   ;;  %s1417_s2 = inlined_call_operand.vmem [shape: f32[128,1], index: 2, kind: input, shape index: {}]   ;;  %s1418_s3 = inlined_call_operand.hbm [shape: f32[2,128,256], index: 3, kind: output, shape index: {}]  }
   0x1   :  { %10 = vsyncpa [#allocation3 + $0x1], 0 }
   0x2   :  { %11 = vsyncpa [#allocation4], 0 }
   0x3   :  { %13 = vsyncpa [#allocation4 + $0x1], 0  ;;  %s925_s12 = smov 0   ;;  %s927_s13 = smov 0  }
   0x4   :  { %s929_s14 = smov 0   ;;  %s931_s15 = smov 0  }
   0x5   :  { %s933_s16 = smov 0   ;;  %s935_s17 = smov 0  }
   0x6   :  { %s937_s18 = smov 0   ;;  %s939_s19 = smov 0  }
   0x7 LB: > { %s662_s20 = sadd.s32 4294967295, %s894_s19   ;;  %s663_s21 = sadd.s32 4294967294, %s894_s19   ;;  %s894_s19 = sphi %s939_s19, %s19_s19   ;;  %s890_s18 = sphi %s937_s18, %s1436_s18   ;;  %s886_s17 = sphi %s935_s17, %s1435_s17   ;;  %s882_s16 = sphi %s933_s16, %s1434_s16   ;;  %s878_s15 = sphi %s931_s15, %s1433_s15   ;;  %s874_s14 = sphi %s929_s14, %s1432_s14   ;;  %s870_s13 = sphi %s927_s13, %s1431_s13   ;;  %s866_s12 = sphi %s925_s12, %s1430_s12  }
   0x8   : > { %s28_s22 = sadd.s32 1, %s886_s17  ;;  %s31_s23 = sadd.s32 1, %s890_s18 }
   0x9   : > { %p29_p0 = scmp.ge.s32.totalorder %s28_s22, 2  ;;  %s40_s24 = sadd.s32 1, %s874_s14 }
   0xa   : > { %p47_p1 = scmp.ne.s32.totalorder %s874_s14, %s870_s13  ;;  %p48_p2 = scmp.eq.s32.totalorder %s894_s19, 0 }
   0xb   : > { %s1438_s22 = smov (%p29_p0, %s28_s22), 0  ;;  %s1440_s23 = smov (!%p29_p0, %s31_s23), %s890_s18 }
   0xc   : > { %s36_s25 = ssub.s32 %s886_s17, %s1438_s22  ;;  %p978_p3 = por %p48_p2, %p47_p1 }
   0xd   : > { %p33_p4 = scmp.ge.s32.totalorder %s1440_s23, 2  ;;  %p53_p5 = scmp.ne.s32.totalorder %s870_s13, %s866_s12 }
   0xe   : > { %p54_p6 = scmp.eq.s32.totalorder %s662_s20, 0  ;;  %p121_p7 = scmp.eq.s32.totalorder %s662_s20, 3 }
   0xf   : > { %s1442_s23 = smov (%p33_p4, %s1440_s23), 0  ;;  %p127_p10 = scmp.eq.s32.totalorder %s663_s21, 3 }
  0x10   : > { %1422 = sst [smem:[#allocation8_spill]] %s1442_s23  ;;  %p986_p8 = por %p54_p6, %p53_p5 }
  0x11   : > { %p990_p9 = por %p121_p7, %p47_p1  ;;  %s35_s29 = ssub.s32 %s890_s18, %s1442_s23 }
  0x12   : > { %s37_s30 = sor.u32 %s36_s25, %s35_s29  ;;  %p996_p12 = por %p127_p10, %p53_p5 }
  0x13   : > { %s1424_s28 = scalar_select %p990_p9, 1, 0 }
  0x14   : > { %p38_p11 = scmp.eq.s32.totalorder %s37_s30, 0  ;;  %p689_p13 = scmp.lt.s32.totalorder %s894_s19, 4 }
  0x15   : > { %s1425_s4 = scalar_select %p996_p12, 1, 0 }
  0x16   : > { %s153_s5 = sand.u32 1, %s874_s14   ;;  %s667_s8 = sshll.u32 %s890_s18, 5 }
  0x17   : > { %s1003_s6 = scalar_select %p38_p11, %s874_s14, %s40_s24  }
  0x18   : > { %s666_s7 = sshll.u32 %s153_s5, 7  ;;  %s162_s9 = sadd.s32 %s886_s17, %s667_s8 }
  0x19   : > { %s157_s10 = scalar_lea.vmem [#allocation2], %s666_s7  ;;  %s668_s20 = sshll.u32 %s162_s9, 7 }
  0x1a   : > { %s165_s11 = sshll.u32 %s157_s10, 4  ;;  %s1012_s25 = scalar_lea.hbm %s1415_s0, %s668_s20  ;;  %s1007_s11 = int_to_ptr.vmem [resolvable:$true] %s165_s11 }
  0x1b   : > { %p1016_p0 = pnand %p689_p13, %p978_p3  ;;  %s1020_s29 = scalar_lea.sflag [#allocation3], %s153_s5 }
  0x1c   : > { %s766_s30 = scalar_lea.hbm %s1012_s25, 2048  ;;  %s771_s7 = scalar_lea.hbm %s1415_s0, 8192 }
  0x1d   : > { %p767_p1 = scmp.ne.s32.totalorder %s1012_s25, %s766_s30  ;;  %p768_p2 = pneg %p1016_p0 }
  0x1e   : > { %p772_p3 = scmp.lt.u32.totalorder %s1012_s25, %s1415_s0  ;;  %p773_p6 = scmp.lt.u32.totalorder %s771_s7, %s766_s30 }
  0x1f   : > { %p769_p4 = pnand %p768_p2, %p767_p1  ;;  %p775_p10 = scmp.lt.u32.totalorder %s766_s30, %s1012_s25 }
  0x20   : > { %p774_p7 = por %p773_p6, %p772_p3 }
  0x21   : > { %p770_p5 = pneg %p769_p4 }
  0x22   : > { %p776_p11 = por %p775_p10, %p774_p7 }
  0x24   : > { %p777_p13 = pnand %p776_p11, %p770_p5 }
  0x26   : > { %780 = shalt.err (!%p777_p13)
}
  0x27   : > { %s781_s5 = scalar_lea.vmem %s1007_s11, 2048  ;;  %s896_s10 = smov [#allocation2]  }
  0x28   : > { %p782_p1 = scmp.ne.s32.totalorder %s1007_s11, %s781_s5  ;;  %s786_s20 = sshll.u32 %s896_s10, 4  ;;  %s787_s20 = int_to_ptr.vmem [resolvable:$false] %s786_s20 }
  0x29   : > { %s788_s21 = scalar_lea.vmem %s787_s20, 4096  ;;  %p789_p9 = scmp.lt.s32.totalorder %s1007_s11, %s787_s20 }
  0x2a   : > { %p784_p4 = pnand %p782_p1, %p768_p2  ;;  %p790_p3 = scmp.lt.s32.totalorder %s788_s21, %s781_s5 }
  0x2c   : > { %p785_p12 = pneg %p784_p4  ;;  %p791_p6 = por %p790_p3, %p789_p9 }
  0x2e   : > { %p792_p7 = pnand %p791_p6, %p785_p12 }
  0x30   : > { %795 = shalt.err (!%p792_p7)
}
  0x31   : > { %s897_s30 = smov 256   ;;  %s898_s23 = smov 128  }
  0x32   : > { %s899_s26 = smov 8   ;;  %p669_p2 = scmp.ge.s32.totalorder %s894_s19, 1 }
  0x33   : > { %684 = dma.hbm_to_vmem [thread:$0]  (!%p1016_p0), %s1012_s25, 2048, %s1007_s11, %s1020_s29, %s897_s30, %s898_s23, %s899_s26  }
  0x34   : > { %p173_p5 = scmp.lt.s32.totalorder %s894_s19, 5 }
  0x36   : > { %p174_p10 = pnand %p669_p2, %p173_p5 }
  0x37   : > { %s1051_s7 = sand.u32 (!%p174_p10), 1, %s870_s13  }
  0x38   : > { %177 = sbr.rel (%p174_p10) target bundleno = 272 (0x110), region = 32  ;;  %s670_s8 = sshll.u32 (!%p174_p10), %s1051_s7, 7 }
  0x39   : > { %s180_s9 = scalar_lea.sflag (!%p174_p10), [#allocation3], %s1051_s7  ;;  %s1057_s5 = scalar_lea.vmem (!%p174_p10), [#allocation2], %s670_s8 }
  0x3f   : > { %857 = dma.done.wait (%p986_p8), %s180_s9, 2048  }
  0x40   : > { %859 = vsyncadd (%p986_p8), %s180_s9, 4294965248  ;;  %v900_v0 = vmov 0   ;;  %v321_v1 = vld [vmem:[%s1416_s1 + $0x10] sm:$0xff]  ;;  %v319_v2 = vld [vmem:[%s1416_s1] sm:$0xff]  ;;  %s560_s30 = scalar_lea.sflag [#allocation4], %s1051_s7  ;;  %p1427_p9 = scmp.ne.s32.totalorder %s1424_s28, 0 }
  0x41   : > { %763 = vset.pattern.permute.xlu1 %v900_v0  ;;  %762 = vset.pattern.permute.xlu0 %v900_v0  ;;  %v322_v3 = vld [vmem:[%s1416_s1 + $0x18] sm:$0xff]  ;;  %v320_v4 = vld [vmem:[%s1416_s1 + $0x8] sm:$0xff]  ;;  %v323_v6 = vld [vmem:[%s1416_s1 + $0x20] sm:$0xff]  ;;  %s901_s26 = smov [#allocation5]  }
  0x42   : > { %347 = vperm.xlu1 %763, %v321_v1   ;;  %337 = vperm.xlu0 %762, %v319_v2   ;;  %v324_v5 = vld [vmem:[%s1416_s1 + $0x28] sm:$0xff]  ;;  %v326_v7 = vld [vmem:[%s1416_s1 + $0x38] sm:$0xff]  ;;  %v325_v8 = vld [vmem:[%s1416_s1 + $0x30] sm:$0xff]  ;;  %s800_s9 = sshll.u32 %s901_s26, 4  ;;  %s801_s9 = int_to_ptr.vmem [resolvable:$false] %s800_s9 }
  0x43   : > { %v328_v9 = vld [vmem:[%s1416_s1 + $0x48] sm:$0xff]  ;;  %v327_v10 = vld [vmem:[%s1416_s1 + $0x40] sm:$0xff]  ;;  %v330_v11 = vld [vmem:[%s1416_s1 + $0x58] sm:$0xff]  ;;  %s802_s11 = scalar_lea.vmem %s801_s9, 4096 }
  0x44   : > { %v329_v12 = vld [vmem:[%s1416_s1 + $0x50] sm:$0xff]  ;;  %v332_v13 = vld [vmem:[%s1416_s1 + $0x68] sm:$0xff]  ;;  %v331_v14 = vld [vmem:[%s1416_s1 + $0x60] sm:$0xff] }
  0x45   : > { %v334_v15 = vld [vmem:[%s1416_s1 + $0x78] sm:$0xff]  ;;  %v333_v16 = vld [vmem:[%s1416_s1 + $0x70] sm:$0xff]  ;;  %v432_v17 = vld [vmem:[%s1417_s2 + $0x8] sm:$0xff] }
  0x46   : > { %352 = vperm.xlu1 %763, %v322_v3   ;;  %342 = vperm.xlu0 %762, %v320_v4   ;;  %v431_v18 = vld [vmem:[%s1417_s2] sm:$0xff]  ;;  %v434_v19 = vld [vmem:[%s1417_s2 + $0x18] sm:$0xff]  ;;  %v433_v20 = vld [vmem:[%s1417_s2 + $0x10] sm:$0xff] }
  0x47   : > { %v1124_v21 = vld [vmem:[%s1057_s5] sm:$0xff]  ;;  %v1127_v22 = vld [vmem:[%s1057_s5 + $0x8] sm:$0xff]  ;;  %v1142_v28 = vld [vmem:[%s1057_s5 + $0x10] sm:$0xff] }
  0x48   : > { %v436_v23 = vld [vmem:[%s1417_s2 + $0x28] sm:$0xff]  ;;  %v435_v24 = vld [vmem:[%s1417_s2 + $0x20] sm:$0xff]  ;;  %v222_v25 = vadd.f32 %v1127_v22, %v1124_v21  ;;  %v243_v26 = vmul.f32 %v1124_v21, %v1124_v21  ;;  %v244_v27 = vmul.f32 %v1127_v22, %v1127_v22  ;;  %v438_v29 = vld [vmem:[%s1417_s2 + $0x38] sm:$0xff]  ;;  %v245_v32 = vmul.f32 %v1142_v28, %v1142_v28 }
  0x49   : > { %v437_v30 = vld [vmem:[%s1417_s2 + $0x30] sm:$0xff]  ;;  %v1154_v34 = vld [vmem:[%s1057_s5 + $0x18] sm:$0xff]  ;;  %v440_v35 = vld [vmem:[%s1417_s2 + $0x48] sm:$0xff] }
  0x4a   : > { %362 = vperm.xlu1 %763, %v324_v5   ;;  %357 = vperm.xlu0 %762, %v323_v6   ;;  %v223_v31 = vadd.f32 %v222_v25, %v1142_v28  ;;  %v259_v33 = vadd.f32 %v244_v27, %v243_v26  ;;  %v439_v36 = vld [vmem:[%s1417_s2 + $0x40] sm:$0xff]  ;;  %v246_v38 = vmul.f32 %v1154_v34, %v1154_v34  ;;  %v442_v41 = vld [vmem:[%s1417_s2 + $0x58] sm:$0xff]  ;;  %v441_v42 = vld [vmem:[%s1417_s2 + $0x50] sm:$0xff] }
  0x4b   : > { %v1166_v40 = vld [vmem:[%s1057_s5 + $0x20] sm:$0xff]  ;;  %v1178_v46 = vld [vmem:[%s1057_s5 + $0x28] sm:$0xff]  ;;  %v1190_v52 = vld [vmem:[%s1057_s5 + $0x30] sm:$0xff] }
  0x4c   : > { %v224_v37 = vadd.f32 %v223_v31, %v1154_v34  ;;  %v260_v39 = vadd.f32 %v259_v33, %v245_v32  ;;  %v247_v44 = vmul.f32 %v1166_v40, %v1166_v40  ;;  %v444_v47 = vld [vmem:[%s1417_s2 + $0x68] sm:$0xff]  ;;  %v443_v48 = vld [vmem:[%s1417_s2 + $0x60] sm:$0xff]  ;;  %v248_v50 = vmul.f32 %v1178_v46, %v1178_v46  ;;  %v446_v53 = vld [vmem:[%s1417_s2 + $0x78] sm:$0xff] }
  0x4d   : > { %v445_v54 = vld [vmem:[%s1417_s2 + $0x70] sm:$0xff]  ;;  %v249_v56 = vmul.f32 %v1190_v52, %v1190_v52  ;;  %v1202_v58 = vld [vmem:[%s1057_s5 + $0x38] sm:$0xff]  ;;  %v1208_v62 = vld [vmem:[%s1057_s5 + $0x40] sm:$0xff] }
  0x4e   : > { %372 = vperm.xlu1 %763, %v326_v7   ;;  %367 = vperm.xlu0 %762, %v325_v8   ;;  %v225_v43 = vadd.f32 %v224_v37, %v1166_v40  ;;  %v261_v45 = vadd.f32 %v260_v39, %v246_v38  ;;  %v250_v60 = vmul.f32 %v1202_v58, %v1202_v58  ;;  %v1214_v2 = vld [vmem:[%s1057_s5 + $0x48] sm:$0xff]  ;;  %v1220_v6 = vld [vmem:[%s1057_s5 + $0x50] sm:$0xff] }
  0x4f   : > { %v251_v0 = vmul.f32 %v1208_v62, %v1208_v62  ;;  %v252_v4 = vmul.f32 %v1214_v2, %v1214_v2  ;;  %v253_v8 = vmul.f32 %v1220_v6, %v1220_v6 }
  0x50   : > { %v226_v49 = vadd.f32 %v225_v43, %v1178_v46  ;;  %v262_v51 = vadd.f32 %v261_v45, %v247_v44 }
  0x52   : > { %382 = vperm.xlu1 %763, %v328_v9   ;;  %377 = vperm.xlu0 %762, %v327_v10   ;;  %v227_v55 = vadd.f32 %v226_v49, %v1190_v52  ;;  %v263_v57 = vadd.f32 %v262_v51, %v248_v50  ;;  %v1226_v10 = vld [vmem:[%s1057_s5 + $0x58] sm:$0xff] }
  0x54   : > { %v228_v59 = vadd.f32 %v227_v55, %v1202_v58  ;;  %v264_v61 = vadd.f32 %v263_v57, %v249_v56 }
  0x56   : > { %392 = vperm.xlu1 %763, %v330_v11   ;;  %387 = vperm.xlu0 %762, %v329_v12   ;;  %v229_v63 = vadd.f32 %v228_v59, %v1208_v62  ;;  %v265_v1 = vadd.f32 %v264_v61, %v250_v60  ;;  %v254_v12 = vmul.f32 %v1226_v10, %v1226_v10 }
  0x58   : > { %v230_v3 = vadd.f32 %v229_v63, %v1214_v2  ;;  %v266_v5 = vadd.f32 %v265_v1, %v251_v0 }
  0x5a   : > { %402 = vperm.xlu1 %763, %v332_v13   ;;  %397 = vperm.xlu0 %762, %v331_v14   ;;  %v231_v7 = vadd.f32 %v230_v3, %v1220_v6  ;;  %v267_v9 = vadd.f32 %v266_v5, %v252_v4  ;;  %v1232_v14 = vld [vmem:[%s1057_s5 + $0x60] sm:$0xff] }
  0x5c   : > { %v232_v11 = vadd.f32 %v231_v7, %v1226_v10  ;;  %v268_v13 = vadd.f32 %v267_v9, %v253_v8 }
  0x5e   : > { %412 = vperm.xlu1 %763, %v334_v15   ;;  %407 = vperm.xlu0 %762, %v333_v16   ;;  %v233_v15 = vadd.f32 %v232_v11, %v1232_v14  ;;  %v255_v16 = vmul.f32 %v1232_v14, %v1232_v14 }
  0x62   : > { %454 = vperm.xlu1 %763, %v432_v17   ;;  %449 = vperm.xlu0 %762, %v431_v18   ;;  %v269_v17 = vadd.f32 %v268_v13, %v254_v12  ;;  %v1238_v18 = vld [vmem:[%s1057_s5 + $0x68] sm:$0xff] }
  0x66   : > { %464 = vperm.xlu1 %763, %v434_v19   ;;  %459 = vperm.xlu0 %762, %v433_v20   ;;  %v234_v19 = vadd.f32 %v233_v15, %v1238_v18  ;;  %v256_v20 = vmul.f32 %v1238_v18, %v1238_v18 }
  0x6a   : > { %474 = vperm.xlu1 %763, %v436_v23   ;;  %469 = vperm.xlu0 %762, %v435_v24   ;;  %v270_v23 = vadd.f32 %v269_v17, %v255_v16  ;;  %v1244_v24 = vld [vmem:[%s1057_s5 + $0x70] sm:$0xff] }
  0x6b   : > { %v235_v25 = vadd.f32 %v234_v19, %v1244_v24  ;;  %v257_v26 = vmul.f32 %v1244_v24, %v1244_v24 }
  0x6c   : > { %v271_v27 = vadd.f32 %v270_v23, %v256_v20 }
  0x6e   : > { %484 = vperm.xlu1 %763, %v438_v29   ;;  %479 = vperm.xlu0 %762, %v437_v30   ;;  %v1250_v29 = vld [vmem:[%s1057_s5 + $0x78] sm:$0xff]  ;;  %v272_v32 = vadd.f32 %v271_v27, %v257_v26  ;;  %s1301_s5 = scalar_lea.vmem [#allocation5], %s670_s8  ;;  %s673_s8 = sshll.u32 %s882_s16, 5 }
  0x6f   : > { %v236_v30 = vadd.f32 %v235_v25, %v1250_v29  ;;  %v258_v31 = vmul.f32 %v1250_v29, %v1250_v29  ;;  %s571_s10 = sadd.s32 %s878_s15, %s673_s8  ;;  %s574_s15 = sshll.u32 %s1301_s5, 4  ;;  %s1359_s15 = int_to_ptr.vmem [resolvable:$true] %s574_s15 }
  0x70   : > { %s674_s16 = sshll.u32 %s571_s10, 7  ;;  %s796_s23 = scalar_lea.vmem %s1359_s15, 2048 }
  0x71   : > { %v237_v33 = vrot.slane %v236_v30, 4  ;;  %s1357_s27 = scalar_lea.hbm %s1418_s3, %s674_s16  ;;  %p797_p8 = scmp.ne.s32.totalorder %s1359_s15, %s796_s23 }
  0x72   : > { %494 = vperm.xlu1 %763, %v440_v35   ;;  %489 = vperm.xlu0 %762, %v439_v36   ;;  %v273_v35 = vadd.f32 %v272_v32, %v258_v31  ;;  %p803_p11 = scmp.lt.s32.totalorder %s1359_s15, %s801_s9  ;;  %p804_p13 = scmp.lt.s32.totalorder %s802_s11, %s796_s23 }
  0x73   : > { %v238_v36 = vadd.f32 %v237_v33, %v236_v30  ;;  %p798_p12 = pnand %p797_p8, %p1427_p9 }
  0x74   : > { %v274_v37 = vrot.slane %v273_v35, 4  ;;  %p805_p1 = por %p804_p13, %p803_p11 }
  0x75   : > { %v239_v38 = vrot.slane %v238_v36, 2  ;;  %p799_p0 = pneg %p798_p12 }
  0x76   : > { %504 = vperm.xlu1 %763, %v442_v41   ;;  %499 = vperm.xlu0 %762, %v441_v42   ;;  %v275_v39 = vadd.f32 %v274_v37, %v273_v35 }
  0x77   : > { %v240_v41 = vadd.f32 %v239_v38, %v238_v36  ;;  %p806_p4 = pnand %p805_p1, %p799_p0 }
  0x78   : > { %v276_v42 = vrot.slane %v275_v39, 2 }
  0x79   : > { %v241_v43 = vrot.slane %v240_v41, 1 }
  0x7a   : > { %514 = vperm.xlu1 %763, %v444_v47   ;;  %509 = vperm.xlu0 %762, %v443_v48   ;;  %v277_v44 = vadd.f32 %v276_v42, %v275_v39 }
  0x7b   : > { %v242_v45 = vadd.f32 %v241_v43, %v240_v41 }
  0x7c   : > { %v278_v47 = vrot.slane %v277_v44, 1 }
  0x7d   : > { %v1255_v49 = vmul.f32 0.0078125, %v242_v45 }
  0x7e   : > { %524 = vperm.xlu1 %763, %v446_v53   ;;  %519 = vperm.xlu0 %762, %v445_v54   ;;  %v279_v48 = vadd.f32 %v278_v47, %v277_v44 }
  0x7f   : > { %v282_v51 = vmul.f32 %v1255_v49, %v1255_v49  ;;  %v287_v8 = vsub.f32 %v1124_v21, %v1255_v49  ;;  %v288_v9 = vsub.f32 %v1127_v22, %v1255_v49  ;;  %v289_v15 = vsub.f32 %v1142_v28, %v1255_v49 }
  0x80   : > { %v281_v50 = vmul.f32 0.0078125, %v279_v48  ;;  %v290_v17 = vsub.f32 %v1154_v34, %v1255_v49  ;;  %v292_v22 = vsub.f32 %v1178_v46, %v1255_v49  ;;  %v291_v23 = vsub.f32 %v1166_v40, %v1255_v49 }
  0x81   : > { %v294_v33 = vsub.f32 %v1202_v58, %v1255_v49  ;;  %v293_v46 = vsub.f32 %v1190_v52, %v1255_v49  ;;  %v296_v52 = vsub.f32 %v1214_v2, %v1255_v49  ;;  %v295_v42 = vsub.f32 %v1208_v62, %v1255_v49 }
  0x82   : > { %v283_v55 = vsub.f32 %v281_v50, %v282_v51  ;;  %v298_v2 = vsub.f32 %v1226_v10, %v1255_v49  ;;  %v297_v62 = vsub.f32 %v1220_v6, %v1255_v49  ;;  %v300_v10 = vsub.f32 %v1238_v18, %v1255_v49 }
  0x83   : > { %v299_v6 = vsub.f32 %v1232_v14, %v1255_v49  ;;  %v302_v14 = vsub.f32 %v1250_v29, %v1255_v49 }
  0x84   : > { %v284_v59 = vmax.f32 %v283_v55, 0.0 }
  0x86   : > { %v285_v63 = vadd.f32 1e-06, %v284_v59 }
  0x88   : > { %764 = vrsqrt.f32 %v285_v63 }
  0x92   : > { %v1271_v11 = vpop.eup %764 }
  0x93   : > { %v303_v16 = vmul.f32 %v1271_v11, %v287_v8  ;;  %v304_v19 = vmul.f32 %v1271_v11, %v288_v9  ;;  %v305_v28 = vmul.f32 %v1271_v11, %v289_v15  ;;  %v306_v26 = vmul.f32 %v1271_v11, %v290_v17 }
  0x94   : > { %v308_v40 = vmul.f32 %v1271_v11, %v292_v22  ;;  %v307_v37 = vmul.f32 %v1271_v11, %v291_v23  ;;  %v310_v45 = vmul.f32 %v1271_v11, %v294_v33  ;;  %v309_v47 = vmul.f32 %v1271_v11, %v293_v46 }
  0x95   : > { %v314_v8 = vmul.f32 %v1271_v11, %v298_v2  ;;  %v313_v9 = vmul.f32 %v1271_v11, %v297_v62  ;;  %v316_v22 = vmul.f32 %v1271_v11, %v300_v10  ;;  %v315_v23 = vmul.f32 %v1271_v11, %v299_v6 }
  0xc1   : > { %v348_v53 = vpop.permute.xlu1 %347  ;;  %v338_v54 = vpop.permute.xlu0 %337 }
  0xc2   : > { %v415_v25 = vmul.f32 %v338_v54, %v303_v16  ;;  %v417_v35 = vmul.f32 %v348_v53, %v305_v28 }
  0xc5   : > { %v353_v56 = vpop.permute.xlu1 %352  ;;  %v343_v57 = vpop.permute.xlu0 %342 }
  0xc6   : > { %v416_v27 = vmul.f32 %v343_v57, %v304_v19  ;;  %v418_v36 = vmul.f32 %v353_v56, %v306_v26  ;;  %v312_v56 = vmul.f32 %v1271_v11, %v296_v52  ;;  %v311_v57 = vmul.f32 %v1271_v11, %v295_v42 }
  0xc9   : > { %v363_v60 = vpop.permute.xlu1 %362  ;;  %v358_v61 = vpop.permute.xlu0 %357 }
  0xca   : > { %v420_v43 = vmul.f32 %v363_v60, %v308_v40  ;;  %v419_v44 = vmul.f32 %v358_v61, %v307_v37 }
  0xcd   : > { %v373_v0 = vpop.permute.xlu1 %372  ;;  %v368_v1 = vpop.permute.xlu0 %367 }
  0xce   : > { %v422_v54 = vmul.f32 %v373_v0, %v310_v45  ;;  %v421_v55 = vmul.f32 %v368_v1, %v309_v47 }
  0xd1   : > { %v1259_v3 = vpop.permute.xlu1 %382  ;;  %v1261_v4 = vpop.permute.xlu0 %377 }
  0xd2   : > { %v424_v0 = vmul.f32 %v1259_v3, %v312_v56  ;;  %v423_v1 = vmul.f32 %v1261_v4, %v311_v57  ;;  %v301_v3 = vsub.f32 %v1244_v24, %v1255_v49 }
  0xd5   : > { %v1263_v5 = vpop.permute.xlu1 %392  ;;  %v1265_v7 = vpop.permute.xlu0 %387 }
  0xd6   : > { %v426_v4 = vmul.f32 %v1263_v5, %v314_v8  ;;  %v425_v19 = vmul.f32 %v1265_v7, %v313_v9  ;;  %v318_v5 = vmul.f32 %v1271_v11, %v302_v14  ;;  %v317_v7 = vmul.f32 %v1271_v11, %v301_v3 }
  0xd9   : > { %v1273_v12 = vpop.permute.xlu1 %402  ;;  %v1275_v13 = vpop.permute.xlu0 %397 }
  0xda   : > { %v428_v24 = vmul.f32 %v1273_v12, %v316_v22  ;;  %v427_v49 = vmul.f32 %v1275_v13, %v315_v23 }
  0xdd   : > { %v1283_v21 = vpop.permute.xlu1 %412  ;;  %v1285_v20 = vpop.permute.xlu0 %407 }
  0xde   : > { %v430_v12 = vmul.f32 %v1283_v21, %v318_v5  ;;  %v429_v13 = vmul.f32 %v1285_v20, %v317_v7 }
  0xe1   : > { %v455_v34 = vpop.permute.xlu1 %454  ;;  %v450_v30 = vpop.permute.xlu0 %449 }
  0xe2   : > { %v528_v31 = vadd.f32 %v455_v34, %v416_v27  ;;  %v527_v32 = vadd.f32 %v450_v30, %v415_v25 }
  0xe4   : > { %544 = vst [vmem:[%s1301_s5 + $0x8] sm:$0xff] %v528_v31  ;;  %543 = vst [vmem:[%s1301_s5] sm:$0xff] %v527_v32 }
  0xe5   : > { %v465_v38 = vpop.permute.xlu1 %464  ;;  %v460_v58 = vpop.permute.xlu0 %459 }
  0xe6   : > { %v530_v39 = vadd.f32 %v465_v38, %v418_v36  ;;  %v529_v41 = vadd.f32 %v460_v58, %v417_v35 }
  0xe8   : > { %546 = vst [vmem:[%s1301_s5 + $0x18] sm:$0xff] %v530_v39  ;;  %545 = vst [vmem:[%s1301_s5 + $0x10] sm:$0xff] %v529_v41 }
  0xe9   : > { %v475_v48 = vpop.permute.xlu1 %474  ;;  %v470_v50 = vpop.permute.xlu0 %469 }
  0xea   : > { %v532_v51 = vadd.f32 %v475_v48, %v420_v43  ;;  %v531_v53 = vadd.f32 %v470_v50, %v419_v44 }
  0xec   : > { %548 = vst [vmem:[%s1301_s5 + $0x28] sm:$0xff] %v532_v51  ;;  %547 = vst [vmem:[%s1301_s5 + $0x20] sm:$0xff] %v531_v53 }
  0xed   : > { %v485_v59 = vpop.permute.xlu1 %484  ;;  %v480_v60 = vpop.permute.xlu0 %479 }
  0xee   : > { %v534_v61 = vadd.f32 %v485_v59, %v422_v54  ;;  %v533_v63 = vadd.f32 %v480_v60, %v421_v55 }
  0xf0   : > { %550 = vst [vmem:[%s1301_s5 + $0x38] sm:$0xff] %v534_v61  ;;  %549 = vst [vmem:[%s1301_s5 + $0x30] sm:$0xff] %v533_v63 }
  0xf1   : > { %v495_v15 = vpop.permute.xlu1 %494  ;;  %v490_v16 = vpop.permute.xlu0 %489 }
  0xf2   : > { %v536_v17 = vadd.f32 %v495_v15, %v424_v0  ;;  %v535_v18 = vadd.f32 %v490_v16, %v423_v1 }
  0xf4   : > { %552 = vst [vmem:[%s1301_s5 + $0x48] sm:$0xff] %v536_v17  ;;  %551 = vst [vmem:[%s1301_s5 + $0x40] sm:$0xff] %v535_v18 }
  0xf5   : > { %v505_v28 = vpop.permute.xlu1 %504  ;;  %v500_v25 = vpop.permute.xlu0 %499 }
  0xf6   : > { %v538_v29 = vadd.f32 %v505_v28, %v426_v4  ;;  %v537_v26 = vadd.f32 %v500_v25, %v425_v19 }
  0xf8   : > { %554 = vst [vmem:[%s1301_s5 + $0x58] sm:$0xff] %v538_v29  ;;  %553 = vst [vmem:[%s1301_s5 + $0x50] sm:$0xff] %v537_v26 }
  0xf9   : > { %v515_v27 = vpop.permute.xlu1 %514  ;;  %v510_v34 = vpop.permute.xlu0 %509 }
  0xfa   : > { %v540_v30 = vadd.f32 %v515_v27, %v428_v24  ;;  %v539_v31 = vadd.f32 %v510_v34, %v427_v49 }
  0xfc   : > { %556 = vst [vmem:[%s1301_s5 + $0x68] sm:$0xff] %v540_v30  ;;  %555 = vst [vmem:[%s1301_s5 + $0x60] sm:$0xff] %v539_v31 }
  0xfd   : > { %v525_v11 = vpop.permute.xlu1 %524  ;;  %v520_v32 = vpop.permute.xlu0 %519 }
  0xfe   : > { %v542_v33 = vadd.f32 %v525_v11, %v430_v12  ;;  %v541_v46 = vadd.f32 %v520_v32, %v429_v13 }
 0x100   : > { %558 = vst [vmem:[%s1301_s5 + $0x78] sm:$0xff] %v542_v33  ;;  %557 = vst [vmem:[%s1301_s5 + $0x70] sm:$0xff] %v541_v46 }
 0x101   : > { %809 = shalt.err (!%p806_p4)
}
 0x102   : > { %s810_s25 = scalar_lea.hbm %s1357_s27, 2048  ;;  %s814_s5 = scalar_lea.hbm %s1418_s3, 8192 }
 0x103   : > { %p811_p3 = scmp.ne.s32.totalorder %s1357_s27, %s810_s25  ;;  %p815_p2 = scmp.lt.u32.totalorder %s1357_s27, %s1418_s3 }
 0x104   : > { %p816_p5 = scmp.lt.u32.totalorder %s814_s5, %s810_s25  ;;  %p818_p8 = scmp.lt.u32.totalorder %s810_s25, %s1357_s27 }
 0x105   : > { %p812_p6 = pnand %p811_p3, %p1427_p9 }
 0x106   : > { %p817_p10 = por %p816_p5, %p815_p2 }
 0x107   : > { %p813_p7 = pneg %p812_p6 }
 0x108   : > { %p819_p12 = por %p818_p8, %p817_p10 }
 0x10a   : > { %p820_p0 = pnand %p819_p12, %p813_p7 }
 0x10c   : > { %823 = shalt.err (!%p820_p0)
}
 0x10d   : > { %s902_s16 = smov 128   ;;  %s903_s20 = smov 256  }
 0x10e   : > { %s904_s21 = smov 8  }
 0x10f   : > { %679 = dma.vmem_to_hbm [thread:$0]  (%p1427_p9), %s1359_s15, 2048, %s1357_s27, %s560_s30, %s902_s16, %s903_s20, %s904_s21  }
 0x110 PF: > { %p690_p11 = scmp.ge.s32.totalorder %s894_s19, 2  ;;  %s589_s23 = sand.u32 1, %s866_s12  }
 0x111   : > { %p1428_p13 = scmp.ne.s32.totalorder %s1425_s4, 0  ;;  %s590_s26 = scalar_lea.sflag [#allocation4], %s589_s23 }
 0x113   : > { %p686_p1 = pnand %p690_p11, %p1428_p13 }
 0x115   : > { %861 = dma.done.wait (!%p686_p1), %s590_s26, 2048  }
 0x116   : > { %863 = vsyncadd (!%p686_p1), %s590_s26, 4294965248  ;;  %s19_s19 = sadd.s32 1, %s894_s19   ;;  %s1429_s28 = sld [smem:[#allocation8_spill]] }
 0x117   : > { %p16_p4 = scmp.ge.s32.totalorder %s19_s19, 6   ;;  %s1430_s12 = smov %s870_s13 }
 0x118   : > { %s1431_s13 = smov %s874_s14  ;;  %s1432_s14 = smov %s1003_s6 }
 0x119   : > { %s1433_s15 = smov %s886_s17  ;;  %s1434_s16 = smov %s890_s18 }
 0x11a   : > { %s1435_s17 = smov %s1438_s22  ;;  %18 = sbr.rel (!%p16_p4) target bundleno = 7 (0x7), region = 77 }
 0x11c   : > { %s1436_s18 = smov %s1429_s28 }
 0x121   :  { %595 = vsyncpa [#allocation3], 1 }
 0x122   :  { %597 = vsyncpa [#allocation3 + $0x1], 1 }
 0x123   :  { %598 = vsyncpa [#allocation4], 1 }
 0x124   :  { %600 = vsyncpa [#allocation4 + $0x1], 1 }

</bundles_post_ra>
